<compile_context>
chip_gen: v7x
topology: tpu7x:2x2x1
jax: 0.10.0
libtpu: 0.0.40
codegen_flags: <defaults>
</compile_context>

<pallas_src>
import jax
import jax.numpy as jnp
from jax.experimental import pallas as pl
from jax.experimental.pallas import tpu as pltpu


def _round_up(x, m):
    return ((x + m - 1) // m) * m


def _cdiv(a, b):
    return -(-a // b)


def _device_kind():
    try:
        return jax.devices()[0].device_kind.lower()
    except Exception:
        return ""


def _default_block_b():
    kind = _device_kind()
    # v5e: single vector-store slot / 4x128^2 MXU -> keep f32 intermediates small.
    if ("v5 lite" in kind) or ("v5e" in kind) or ("v5lite" in kind):
        return 128
    return 512


def _num_tensorcores():
    # v7x has 2 TensorCores per chip; ensure the "parallel" batch axis has at
    # least 2 tiles there so one TC does not idle.  v5e/v6e have 1 TC.
    kind = _device_kind()
    return 2 if "v7" in kind else 1


def _critic_kernel(xa_ref, w1_ref, b1_ref, w2_ref, b2_ref, w3_ref, b3_ref, o_ref):
    # Layer 1: single merged matmul over the padded [x || action] operand.
    xa = xa_ref[...].astype(jnp.bfloat16)                                  # [TB, IN_P]
    a1 = jnp.dot(xa, w1_ref[...], preferred_element_type=jnp.float32)     # [TB, H1P] f32
    # Fused bias + ReLU epilogue in bf16: only the bf16 activation stays live.
    h1 = jnp.maximum(a1.astype(jnp.bfloat16) + b1_ref[...], 0)            # [TB, H1P] bf16

    # Layer 2.
    a2 = jnp.dot(h1, w2_ref[...], preferred_element_type=jnp.float32)     # [TB, H2P] f32
    h2 = jnp.maximum(a2.astype(jnp.bfloat16) + b2_ref[...], 0)            # [TB, H2P] bf16

    # Layer 3 (out_features = 1): VPU multiply + XLU lane reduction, f32 exact.
    q = jnp.sum(h2.astype(jnp.float32) * w3_ref[...], axis=-1, keepdims=True)
    o_ref[...] = (q + b3_ref[...]).astype(o_ref.dtype)                    # [TB, 1]


def critic_forward(x, action, kparams, *, block_b=None, min_tiles=None):
    """x: [B, state_dim] f32, action: [B, action_dim] f32 -> [B, 1] f32.

    kparams are the kernel-layout params from prepare_params().
    """
    w1, b1, w2, b2, w3, b3 = kparams
    B = x.shape[0]
    in1 = x.shape[1] + action.shape[1]
    IN_P, H1P = w1.shape
    H2P = w2.shape[1]

    if block_b is None:
        block_b = _default_block_b()
    if min_tiles is None:
        min_tiles = _num_tensorcores()

    # Tile selection: TB divides the (padded) batch tightly so padding waste is
    # bounded, and we force >=2 tiles when a second TensorCore exists and the
    # batch is big enough to split (>= 8 rows per tile).
    n_tiles = max(1, _cdiv(B, block_b))
    if B >= 8 * min_tiles:
        n_tiles = max(n_tiles, min_tiles)
    TB = max(8, _round_up(_cdiv(B, n_tiles), 8))
    pB = n_tiles * TB

    # Host-side concat + zero-pad of the tiny [B, state+action] operand; this
    # feeds the single merged layer-1 matmul.  Zero-padding is exact.
    xa = jnp.concatenate([x, action], axis=1)
    xa = jnp.pad(xa, ((0, pB - B), (0, IN_P - in1)))

    resident = lambda shape: pl.BlockSpec(shape, lambda i: (0, 0))  # weights stay in VMEM

    out = pl.pallas_call(
        _critic_kernel,
        out_shape=jax.ShapeDtypeStruct((pB, 1), jnp.float32),
        grid=(n_tiles,),
        in_specs=[
            pl.BlockSpec((TB, IN_P), lambda i: (i, 0)),   # xa   (f32, batch-tiled)
            resident((IN_P, H1P)),                        # w1   (bf16)
            resident((1, H1P)),                           # b1   (bf16)
            resident((H1P, H2P)),                         # w2   (bf16)
            resident((1, H2P)),                           # b2   (bf16)
            resident((1, H2P)),                           # w3   (f32, row vector)
            resident((1, 1)),                             # b3   (f32)
        ],
        out_specs=pl.BlockSpec((TB, 1), lambda i: (i, 0)),
        compiler_params=pltpu.CompilerParams(
            dimension_semantics=("parallel",),   # batch tiles are independent
        ),
    )(xa, w1, b1, w2, b2, w3, b3)
    return out[:B]


def init_params(key, state_dim=8, action_dim=2, hidden_dim=(400, 300)):
    """Torch-like logical params (f32, unpadded). Weights [in, out], biases [1, out]."""
    h1, h2 = hidden_dim
    in1 = state_dim + action_dim
    ks = jax.random.split(key, 6)

    def lin(kw, kb, fan_in, fan_out):
        bound = 1.0 / jnp.sqrt(jnp.float32(fan_in))
        w = jax.random.uniform(kw, (fan_in, fan_out), jnp.float32, -bound, bound)
        b = jax.random.uniform(kb, (1, fan_out), jnp.float32, -bound, bound)
        return w, b

    w1, b1 = lin(ks[0], ks[1], in1, h1)
    w2, b2 = lin(ks[2], ks[3], h1, h2)
    w3, b3 = lin(ks[4], ks[5], h2, 1)
    return (w1, b1, w2, b2, w3, b3)


def prepare_params(params, state_dim, action_dim):
    """Kernel layout: one merged W1 over [x || action] rows (zero-padded 10 -> 16),
    hidden dims zero-padded to 128-lane multiples, matmul weights + their biases in
    bf16 (f32 MXU accumulation), final layer kept in f32.  Zero-padding is exact."""
    w1, b1, w2, b2, w3, b3 = params
    in1, h1 = w1.shape
    h2 = w2.shape[1]
    assert in1 == state_dim + action_dim
    IN_P = _round_up(in1, 8)     # 10  -> 16
    H1P = _round_up(h1, 128)     # 400 -> 512
    H2P = _round_up(h2, 128)     # 300 -> 384

    w1p = jnp.zeros((IN_P, H1P), jnp.float32).at[:in1, :h1].set(w1).astype(jnp.bfloat16)
    b1p = jnp.zeros((1, H1P), jnp.float32).at[:, :h1].set(b1).astype(jnp.bfloat16)
    w2p = jnp.zeros((H1P, H2P), jnp.float32).at[:h1, :h2].set(w2).astype(jnp.bfloat16)
    b2p = jnp.zeros((1, H2P), jnp.float32).at[:, :h2].set(b2).astype(jnp.bfloat16)
    w3p = jnp.zeros((1, H2P), jnp.float32).at[:, :h2].set(w3.reshape(1, h2))
    b3p = b3.reshape(1, 1).astype(jnp.float32)
    return (w1p, b1p, w2p, b2p, w3p, b3p)


def critic_forward_ref_f32(x, action, params):
    """Full-precision reference (original torch semantics)."""
    w1, b1, w2, b2, w3, b3 = params
    xa = jnp.concatenate([x, action], axis=1)
    h = jnp.maximum(xa @ w1 + b1, 0.0)
    h = jnp.maximum(h @ w2 + b2, 0.0)
    return h @ w3 + b3


def critic_forward_ref_bf16(x, action, kparams):
    """Plain-JAX reference replicating the kernel's bf16/f32 mixed precision exactly."""
    w1, b1, w2, b2, w3, b3 = kparams
    in1 = x.shape[1] + action.shape[1]
    IN_P = w1.shape[0]
    xa = jnp.concatenate([x, action], axis=1)
    xa = jnp.pad(xa, ((0, 0), (0, IN_P - in1))).astype(jnp.bfloat16)
    a1 = jnp.dot(xa, w1, preferred_element_type=jnp.float32)
    h1 = jnp.maximum(a1.astype(jnp.bfloat16) + b1, 0)
    a2 = jnp.dot(h1, w2, preferred_element_type=jnp.float32)
    h2 = jnp.maximum(a2.astype(jnp.bfloat16) + b2, 0)
    return jnp.sum(h2.astype(jnp.float32) * w3, axis=-1, keepdims=True) + b3


if __name__ == "__main__":
    key = jax.random.PRNGKey(0)
    k_params, k_x, k_a = jax.random.split(key, 3)

    state_dim, action_dim = 8, 2
    params = init_params(k_params, state_dim=state_dim, action_dim=action_dim,
                         hidden_dim=(400, 300))
    kparams = prepare_params(params, state_dim, action_dim)

    # Two small batch sizes: one tiny, one that exercises the padding/tile logic.
    for B in (8, 37):
        kb = jax.random.fold_in(k_x, B)
        kx, ka = jax.random.split(kb)
        x = jax.random.normal(kx, (B, state_dim), jnp.float32)
        action = jax.random.normal(ka, (B, action_dim), jnp.float32)

        q = jax.block_until_ready(critic_forward(x, action, kparams))
        assert q.shape == (B, 1)

        # Exact-precision check vs a plain-JAX path using the same bf16 kernel params.
        q_ref_bf16 = critic_forward_ref_bf16(x, action, kparams)
        assert jnp.allclose(q, q_ref_bf16, atol=2e-3, rtol=2e-3), \
            f"mismatch vs bf16 reference (B={B})"

        # Sanity check vs the full-f32 torch-semantics reference (loose: bf16 weights).
        q_ref_f32 = critic_forward_ref_f32(x, action, params)
        assert jnp.allclose(q, q_ref_f32, atol=5e-2, rtol=5e-2), \
            f"mismatch vs f32 reference (B={B})"

    print("KERNEL_OK")
</pallas_src>

<mosaic_0001>
module attributes {stable_mosaic.version = 11 : i64} {
  func.func @_critic_kernel(%arg0: i32, %arg1: memref<8x16xf32, #tpu.memory_space<vmem>>, %arg2: memref<16x512xbf16, #tpu.memory_space<vmem>>, %arg3: memref<1x512xbf16, #tpu.memory_space<vmem>>, %arg4: memref<512x384xbf16, #tpu.memory_space<vmem>>, %arg5: memref<1x384xbf16, #tpu.memory_space<vmem>>, %arg6: memref<1x384xf32, #tpu.memory_space<vmem>>, %arg7: memref<1x1xf32, #tpu.memory_space<vmem>>, %arg8: memref<8x1xf32, #tpu.memory_space<vmem>>) attributes {dimension_semantics = [#tpu.dimension_semantics<parallel>], iteration_bounds = array<i64: 1>, scalar_prefetch = 0 : i64, scratch_operands = 0 : i64, tpu.core_type = #tpu.core_type<tc>, window_params = [{transform_indices = @transform_0, window_bounds = array<i64: 8, 16>}, {pipeline_mode = #tpu.pipeline_mode<synchronous>, transform_indices = @transform_1, window_bounds = array<i64: 16, 512>}, {pipeline_mode = #tpu.pipeline_mode<synchronous>, transform_indices = @transform_2, window_bounds = array<i64: 1, 512>}, {pipeline_mode = #tpu.pipeline_mode<synchronous>, transform_indices = @transform_3, window_bounds = array<i64: 512, 384>}, {pipeline_mode = #tpu.pipeline_mode<synchronous>, transform_indices = @transform_4, window_bounds = array<i64: 1, 384>}, {pipeline_mode = #tpu.pipeline_mode<synchronous>, transform_indices = @transform_5, window_bounds = array<i64: 1, 384>}, {pipeline_mode = #tpu.pipeline_mode<synchronous>, transform_indices = @transform_6, window_bounds = array<i64: 1, 1>}, {transform_indices = @transform_7, window_bounds = array<i64: 8, 1>}]} {
    %c0 = arith.constant 0 : index
    %c0_0 = arith.constant 0 : index
    %0 = vector.load %arg1[%c0, %c0_0] : memref<8x16xf32, #tpu.memory_space<vmem>>, vector<8x16xf32>
    %1 = arith.truncf %0 : vector<8x16xf32> to vector<8x16xbf16>
    %c0_1 = arith.constant 0 : index
    %c0_2 = arith.constant 0 : index
    %2 = vector.load %arg2[%c0_1, %c0_2] : memref<16x512xbf16, #tpu.memory_space<vmem>>, vector<16x512xbf16>
    %cst = arith.constant dense<0.000000e+00> : vector<8x512xf32>
    %3 = tpu.matmul %1, %2, %cst {dimension_numbers = #tpu.dot_dimension_numbers<[1], [0], [0], [1], [0, 0, 1, 1], [], []>} : vector<8x16xbf16>, vector<16x512xbf16>, vector<8x512xf32> -> vector<8x512xf32>
    %4 = arith.truncf %3 : vector<8x512xf32> to vector<8x512xbf16>
    %c0_3 = arith.constant 0 : index
    %c0_4 = arith.constant 0 : index
    %5 = vector.load %arg3[%c0_3, %c0_4] : memref<1x512xbf16, #tpu.memory_space<vmem>>, vector<1x512xbf16>
    %6 = vector.broadcast %5 : vector<1x512xbf16> to vector<8x512xbf16>
    %7 = arith.addf %4, %6 : vector<8x512xbf16>
    %cst_5 = arith.constant 0.000000e+00 : bf16
    %8 = vector.broadcast %cst_5 : bf16 to vector<8x512xbf16>
    %9 = arith.maximumf %7, %8 : vector<8x512xbf16>
    %c0_6 = arith.constant 0 : index
    %c0_7 = arith.constant 0 : index
    %10 = vector.load %arg4[%c0_6, %c0_7] : memref<512x384xbf16, #tpu.memory_space<vmem>>, vector<512x384xbf16>
    %cst_8 = arith.constant dense<0.000000e+00> : vector<8x384xf32>
    %11 = tpu.matmul %9, %10, %cst_8 {dimension_numbers = #tpu.dot_dimension_numbers<[1], [0], [0], [1], [0, 0, 1, 1], [], []>} : vector<8x512xbf16>, vector<512x384xbf16>, vector<8x384xf32> -> vector<8x384xf32>
    %12 = arith.truncf %11 : vector<8x384xf32> to vector<8x384xbf16>
    %c0_9 = arith.constant 0 : index
    %c0_10 = arith.constant 0 : index
    %13 = vector.load %arg5[%c0_9, %c0_10] : memref<1x384xbf16, #tpu.memory_space<vmem>>, vector<1x384xbf16>
    %14 = vector.broadcast %13 : vector<1x384xbf16> to vector<8x384xbf16>
    %15 = arith.addf %12, %14 : vector<8x384xbf16>
    %cst_11 = arith.constant 0.000000e+00 : bf16
    %16 = vector.broadcast %cst_11 : bf16 to vector<8x384xbf16>
    %17 = arith.maximumf %15, %16 : vector<8x384xbf16>
    %18 = arith.extf %17 : vector<8x384xbf16> to vector<8x384xf32>
    %c0_12 = arith.constant 0 : index
    %c0_13 = arith.constant 0 : index
    %19 = vector.load %arg6[%c0_12, %c0_13] : memref<1x384xf32, #tpu.memory_space<vmem>>, vector<1x384xf32>
    %20 = vector.broadcast %19 : vector<1x384xf32> to vector<8x384xf32>
    %21 = arith.mulf %18, %20 : vector<8x384xf32>
    %cst_14 = arith.constant dense<0.000000e+00> : vector<8xf32>
    %22 = vector.multi_reduction <add>, %21, %cst_14 [1] : vector<8x384xf32> to vector<8xf32>
    %23 = vector.shape_cast %22 : vector<8xf32> to vector<8x1xf32>
    %c0_15 = arith.constant 0 : index
    %c0_16 = arith.constant 0 : index
    %24 = vector.load %arg7[%c0_15, %c0_16] : memref<1x1xf32, #tpu.memory_space<vmem>>, vector<1x1xf32>
    %25 = vector.broadcast %24 : vector<1x1xf32> to vector<8x1xf32>
    %26 = arith.addf %23, %25 : vector<8x1xf32>
    %c0_17 = arith.constant 0 : index
    %c0_18 = arith.constant 0 : index
    %27 = vector.load %arg8[%c0_17, %c0_18] : memref<8x1xf32, #tpu.memory_space<vmem>>, vector<8x1xf32>
    tpu.vector_store %arg8[%c0_17, %c0_18], %26 {strides = array<i32>} : memref<8x1xf32, #tpu.memory_space<vmem>>, vector<8x1xf32>,
    return
  }
  func.func @transform_0(%arg0: i32) -> (i32, i32) {
    %c0_i32 = arith.constant 0 : i32
    %c0_i32_0 = arith.constant 0 : i32
    return %arg0, %c0_i32 : i32, i32
  }
  func.func @transform_1(%arg0: i32) -> (i32, i32) {
    %c0_i32 = arith.constant 0 : i32
    %c0_i32_0 = arith.constant 0 : i32
    %c0_i32_1 = arith.constant 0 : i32
    return %c0_i32, %c0_i32_0 : i32, i32
  }
  func.func @transform_2(%arg0: i32) -> (i32, i32) {
    %c0_i32 = arith.constant 0 : i32
    %c0_i32_0 = arith.constant 0 : i32
    %c0_i32_1 = arith.constant 0 : i32
    return %c0_i32, %c0_i32_0 : i32, i32
  }
  func.func @transform_3(%arg0: i32) -> (i32, i32) {
    %c0_i32 = arith.constant 0 : i32
    %c0_i32_0 = arith.constant 0 : i32
    %c0_i32_1 = arith.constant 0 : i32
    return %c0_i32, %c0_i32_0 : i32, i32
  }
  func.func @transform_4(%arg0: i32) -> (i32, i32) {
    %c0_i32 = arith.constant 0 : i32
    %c0_i32_0 = arith.constant 0 : i32
    %c0_i32_1 = arith.constant 0 : i32
    return %c0_i32, %c0_i32_0 : i32, i32
  }
  func.func @transform_5(%arg0: i32) -> (i32, i32) {
    %c0_i32 = arith.constant 0 : i32
    %c0_i32_0 = arith.constant 0 : i32
    %c0_i32_1 = arith.constant 0 : i32
    return %c0_i32, %c0_i32_0 : i32, i32
  }
  func.func @transform_6(%arg0: i32) -> (i32, i32) {
    %c0_i32 = arith.constant 0 : i32
    %c0_i32_0 = arith.constant 0 : i32
    %c0_i32_1 = arith.constant 0 : i32
    return %c0_i32, %c0_i32_0 : i32, i32
  }
  func.func @transform_7(%arg0: i32) -> (i32, i32) {
    %c0_i32 = arith.constant 0 : i32
    %c0_i32_0 = arith.constant 0 : i32
    return %arg0, %c0_i32 : i32, i32
  }
}

</mosaic_0001>

<bundles_post_ra>
// kernel: tpu_custom_call.1
= control target key start
LH: loop header
LB: loop body
LE: loop exit
PB: predicated region body
PF: predicated region fallthrough
CT: control target
= control target key end

     0   :  { %s1649_s0 = inlined_call_operand.hbm [shape: f32[8,16], index: 0, kind: input, shape index: {}]   ;;  %s1650_s1 = inlined_call_operand.hbm [shape: bf16[16,512], index: 1, kind: input, shape index: {}]   ;;  %s1651_s2 = inlined_call_operand.vmem [shape: bf16[1,512], index: 2, kind: input, shape index: {}]   ;;  %s1652_s3 = inlined_call_operand.hbm [shape: bf16[512,384], index: 3, kind: input, shape index: {}]   ;;  %s1653_s4 = inlined_call_operand.vmem [shape: bf16[1,384], index: 4, kind: input, shape index: {}]   ;;  %s1654_s5 = inlined_call_operand.vmem [shape: f32[1,384], index: 5, kind: input, shape index: {}]   ;;  %s1655_s6 = inlined_call_operand.<no memory space> [shape: f32[1,1], index: 6, kind: input, shape index: {}]   ;;  %s1656_s7 = inlined_call_operand.vmem [shape: f32[8,1], index: 7, kind: output, shape index: {}]  }
   0x1   :  { %v12_v0 = vstv %s1655_s6 }
   0x2   :  { %13 = vst [vmem:[#allocation2] sm:$0x1] %v12_v0 }
   0x3   :  { %14 = vsyncpa [#allocation4], 0 }
   0x4   :  { %15 = vsyncpa [#allocation6], 0  ;;  %s1512_s26 = smov [#allocation5]   ;;  %s1442_s30 = scalar_lea.hbm %s1650_s1, 512 }
   0x5   :  { %s31_s27 = sshll.u32 %s1512_s26, 4  ;;  %p1443_p0 = scmp.ne.s32.totalorder %s1650_s1, %s1442_s30  ;;  %s32_s27 = int_to_ptr.vmem [resolvable:$true] %s31_s27 }
   0x6   :  { %p1446_p1 = scmp.lt.u32.totalorder %s1442_s30, %s1650_s1 }
   0x8   :  { %p1448_p2 = pnand %p1446_p1, %p1443_p0 }
   0xa   :  { %1451 = shalt.err (!%p1448_p2)
}
   0xb   :  { %s1452_s6 = scalar_lea.vmem %s32_s27, 512  ;;  %p1457_p4 = scmp.lt.s32.totalorder %s32_s27, %s32_s27 }
   0xc   :  { %p1453_p3 = scmp.ne.s32.totalorder %s32_s27, %s1452_s6  ;;  %p1458_p5 = scmp.lt.s32.totalorder %s1452_s6, %s1452_s6 }
   0xe   :  { %p1459_p6 = por %p1458_p5, %p1457_p4 }
  0x10   :  { %p1460_p7 = pnand %p1459_p6, %p1453_p3 }
  0x12   :  { %1463 = shalt.err (!%p1460_p7)
}
  0x13   :  { %s1513_s12 = smov 256   ;;  %s1514_s13 = smov 16  }
  0x14   :  { %37 = dma.hbm_to_vmem [thread:$0]  %s1650_s1, 512, %s32_s27, [#allocation6], %s1513_s12, %s1513_s12, %s1514_s13  }
  0x15   :  { %s1515_s16 = smov [#allocation3]   ;;  %s1516_s18 = smov [#allocation7]  }
  0x16   :  { %s22_s17 = sshll.u32 %s1515_s16, 4  ;;  %s45_s19 = sshll.u32 %s1516_s18, 4  ;;  %s23_s17 = int_to_ptr.vmem [resolvable:$true] %s22_s17  ;;  %s46_s19 = int_to_ptr.vmem [resolvable:$true] %s45_s19 }
  0x17   :  { %s1464_s22 = scalar_lea.hbm %s1649_s0, 128 }
  0x18   :  { %p1465_p8 = scmp.ne.s32.totalorder %s1649_s0, %s1464_s22  ;;  %p1468_p9 = scmp.lt.u32.totalorder %s1464_s22, %s1649_s0 }
  0x1a   :  { %p1470_p10 = pnand %p1468_p9, %p1465_p8 }
  0x1c   :  { %1473 = shalt.err (!%p1470_p10)
}
  0x1d   :  { %s1474_s1 = scalar_lea.vmem %s23_s17, 128  ;;  %p1479_p12 = scmp.lt.s32.totalorder %s23_s17, %s23_s17 }
  0x1e   :  { %p1475_p11 = scmp.ne.s32.totalorder %s23_s17, %s1474_s1  ;;  %p1480_p13 = scmp.lt.s32.totalorder %s1474_s1, %s1474_s1 }
  0x20   :  { %p1481_p0 = por %p1480_p13, %p1479_p12 }
  0x22   :  { %p1482_p1 = pnand %p1481_p0, %p1475_p11 }
  0x24   :  { %1485 = shalt.err (!%p1482_p1)
}
  0x25   :  { %25 = dma.hbm_to_vmem [thread:$0]  %s1649_s0, 128, %s23_s17, [#allocation4]  }
  0x26   :  { %s1486_s8 = scalar_lea.hbm %s1652_s3, 12288 }
  0x27   :  { %p1487_p2 = scmp.ne.s32.totalorder %s1652_s3, %s1486_s8  ;;  %p1490_p3 = scmp.lt.u32.totalorder %s1486_s8, %s1652_s3 }
  0x29   :  { %p1492_p4 = pnand %p1490_p3, %p1487_p2 }
  0x2b   :  { %1495 = shalt.err (!%p1492_p4)
}
  0x2c   :  { %s1496_s12 = scalar_lea.vmem %s46_s19, 12288  ;;  %p1501_p6 = scmp.lt.s32.totalorder %s46_s19, %s46_s19 }
  0x2d   :  { %p1497_p5 = scmp.ne.s32.totalorder %s46_s19, %s1496_s12  ;;  %p1502_p7 = scmp.lt.s32.totalorder %s1496_s12, %s1496_s12 }
  0x2f   :  { %p1503_p8 = por %p1502_p7, %p1501_p6 }
  0x31   :  { %p1504_p9 = pnand %p1503_p8, %p1497_p5 }
  0x33   :  { %1507 = shalt.err (!%p1504_p9)
}
  0x34   :  { %s1517_s0 = smov 192   ;;  %s1518_s13 = smov 12  }
  0x35   :  { %51 = dma.hbm_to_vmem [thread:$0]  %s1652_s3, 12288, %s46_s19, [#allocation6], %s1517_s0, %s1517_s0, %s1518_s13  }
  0x36   :  { %1508 = dma.done.wait [#allocation4], 128  }
  0x37   :  { %1509 = vsyncadd [#allocation4], 4294967168 }
  0x38   :  { %1510 = dma.done.wait [#allocation6], 12800  }
  0x39   :  { %1511 = vsyncadd [#allocation6], 4294954496  ;;  %v1519_v1 = vmov 0   ;;  %v1308_v2 = vld [vmem:[#allocation5 + $0x4] ss:$16 sps:$4 sm:$0xff]   ;;  %v68_v4 = vld [vmem:[#allocation3] sm:$0xff]  ;;  %v197_v60 = vlaneseq }
  0x3a   :  { %130 = vmatprep.mubr.bf16.mxu1 %v1519_v1  ;;  %v1310_v3 = vld [vmem:[#allocation5] ss:$16 sps:$4 sm:$0xff]   ;;  %98 = vmatprep.subr.bf16.mxu1 %v1308_v2  ;;  %v69_v5 = vpack.c.bf16 %v68_v4, %v68_v4  ;;  %v1311_v6 = vld [vmem:[#allocation5 + $0x8] ss:$16 sps:$4 sm:$0xff]   ;;  %v1313_v7 = vld [vmem:[#allocation5 + $0xc] ss:$16 sps:$4 sm:$0xff]  }
  0x3b   :  { %99 = vmatpush1.bf16.msra.mxu1 %v1310_v3  ;;  %vm94_vm0 = vcmask 130048   ;;  %v1314_v8 = vld [vmem:[#allocation7 + $0x4] ss:$12 sps:$4 sm:$0xff]   ;;  %v1316_v9 = vld [vmem:[#allocation7] ss:$12 sps:$4 sm:$0xff]   ;;  %v1604_v62 = vshrl.u32 %v197_v60, 7 }
  0x3c   :  { %139 = vmatprep.subr.bf16.mxu1 %v1313_v7  ;;  %886 = vmatprep.subr.bf16.mxu0 %v1314_v8  ;;  %v1317_v10 = vld [vmem:[#allocation7 + $0x1c] ss:$12 sps:$4 sm:$0xff]   ;;  %v1319_v11 = vld [vmem:[#allocation7 + $0x18] ss:$12 sps:$4 sm:$0xff]   ;;  %v1320_v12 = vld [vmem:[#allocation7 + $0x34] ss:$12 sps:$4 sm:$0xff]  }
  0x3d   :  { %887 = vmatpush1.bf16.msra.mxu0 %v1316_v9  ;;  %v1322_v13 = vld [vmem:[#allocation7 + $0x30] ss:$12 sps:$4 sm:$0xff]   ;;  %v1323_v14 = vld [vmem:[#allocation7 + $0x4c] ss:$12 sps:$4 sm:$0xff]   ;;  %v1325_v15 = vld [vmem:[#allocation7 + $0x48] ss:$12 sps:$4 sm:$0xff]  }
  0x3e   :  { %1150 = vmatmul.mubr.msk.bf16.vlgmr.msra.gmra.mrb[0].mxu1 %vm94_vm0, %v69_v5  ;;  %888 = vmatprep.subr.bf16.mxu0 %v1317_v10  ;;  %v1326_v16 = vld [vmem:[#allocation7 + $0x64] ss:$12 sps:$4 sm:$0xff]   ;;  %v1340_v17 = vld [vmem:[#allocation7 + $0xc8] ss:$12 sps:$4 sm:$0xff]   ;;  %v1328_v19 = vld [vmem:[#allocation7 + $0x60] ss:$12 sps:$4 sm:$0xff]  }
  0x3f   :  { %140 = vmatpush1.bf16.msra.mxu1 %v1311_v6  ;;  %171 = vmatprep.mubr.bf16.mxu1 %v1519_v1  ;;  %v1342_v18 = vld [vmem:[#allocation7 + $0x8] ss:$12 sps:$4 sm:$0xff]   ;;  %v1345_v20 = vld [vmem:[#allocation7 + $0xe0] ss:$12 sps:$4 sm:$0xff]   ;;  %v1331_v23 = vld [vmem:[#allocation7 + $0x78] ss:$12 sps:$4 sm:$0xff]  }
  0x40   :  { %1251 = vmatprep.subr.bf16.mxu1 %v1340_v17  ;;  %v1329_v21 = vld [vmem:[#allocation7 + $0x7c] ss:$12 sps:$4 sm:$0xff]   ;;  %v1347_v22 = vld [vmem:[#allocation7 + $0x20] ss:$12 sps:$4 sm:$0xff]   ;;  %v1350_v25 = vld [vmem:[#allocation7 + $0xf8] ss:$12 sps:$4 sm:$0xff]  }
  0x41   :  { %889 = vmatpush1.bf16.msra.mxu0 %v1319_v11  ;;  %v1332_v24 = vld [vmem:[#allocation7 + $0x94] ss:$12 sps:$4 sm:$0xff]   ;;  %v1352_v26 = vld [vmem:[#allocation7 + $0x38] ss:$12 sps:$4 sm:$0xff]   ;;  %v1334_v27 = vld [vmem:[#allocation7 + $0x90] ss:$12 sps:$4 sm:$0xff]  }
  0x42   :  { %890 = vmatprep.subr.bf16.mxu0 %v1320_v12  ;;  %v1355_v28 = vld [vmem:[#allocation7 + $0x110] ss:$12 sps:$4 sm:$0xff]   ;;  %v1335_v30 = vld [vmem:[#allocation7 + $0xac] ss:$12 sps:$4 sm:$0xff]   ;;  %v1360_v31 = vld [vmem:[#allocation7 + $0x128] ss:$12 sps:$4 sm:$0xff]  }
  0x43   :  { %v1357_v29 = vld [vmem:[#allocation7 + $0x50] ss:$12 sps:$4 sm:$0xff]   ;;  %v1337_v32 = vld [vmem:[#allocation7 + $0xa8] ss:$12 sps:$4 sm:$0xff]   ;;  %v1341_v35 = vld [vmem:[#allocation7 + $0xc0] ss:$12 sps:$4 sm:$0xff]  }
  0x44   :  { %v1362_v33 = vld [vmem:[#allocation7 + $0x68] ss:$12 sps:$4 sm:$0xff]   ;;  %v1338_v34 = vld [vmem:[#allocation7 + $0xc4] ss:$12 sps:$4 sm:$0xff]   ;;  %v1365_v36 = vld [vmem:[#allocation7 + $0x140] ss:$12 sps:$4 sm:$0xff]  }
  0x45   :  { %891 = vmatpush1.bf16.msra.mxu0 %v1322_v13  ;;  %v1343_v37 = vld [vmem:[#allocation7 + $0xdc] ss:$12 sps:$4 sm:$0xff]   ;;  %v1367_v38 = vld [vmem:[#allocation7 + $0x80] ss:$12 sps:$4 sm:$0xff]   ;;  %v1346_v39 = vld [vmem:[#allocation7 + $0xd8] ss:$12 sps:$4 sm:$0xff]  }
  0x46   :  { %1151 = vmatmul.mubr.msk.bf16.vlgmr.msra.gmra.mrb[4].mxu1 %vm94_vm0, %v69_v5  ;;  %892 = vmatprep.subr.bf16.mxu0 %v1323_v14  ;;  %v1348_v40 = vld [vmem:[#allocation7 + $0xf4] ss:$12 sps:$4 sm:$0xff]   ;;  %v1351_v41 = vld [vmem:[#allocation7 + $0xf0] ss:$12 sps:$4 sm:$0xff]   ;;  %v1353_v42 = vld [vmem:[#allocation7 + $0x10c] ss:$12 sps:$4 sm:$0xff]  }
  0x47   :  { %1252 = vmatpush3.bf16.msra.mxu1 %v1342_v18  ;;  %v1356_v43 = vld [vmem:[#allocation7 + $0x108] ss:$12 sps:$4 sm:$0xff]   ;;  %v1358_v44 = vld [vmem:[#allocation7 + $0x124] ss:$12 sps:$4 sm:$0xff]   ;;  %v1361_v45 = vld [vmem:[#allocation7 + $0x120] ss:$12 sps:$4 sm:$0xff]  }
  0x48   :  { %1253 = vmatprep.subr.bf16.mxu1 %v1345_v20  ;;  %v1363_v46 = vld [vmem:[#allocation7 + $0x13c] ss:$12 sps:$4 sm:$0xff]   ;;  %v1366_v47 = vld [vmem:[#allocation7 + $0x138] ss:$12 sps:$4 sm:$0xff]   ;;  %v1368_v48 = vld [vmem:[#allocation7 + $0x154] ss:$12 sps:$4 sm:$0xff]  }
  0x49   :  { %893 = vmatpush1.bf16.msra.mxu0 %v1325_v15  ;;  %v1370_v49 = vld [vmem:[#allocation7 + $0x158] ss:$12 sps:$4 sm:$0xff]   ;;  %v1371_v50 = vld [vmem:[#allocation7 + $0x150] ss:$12 sps:$4 sm:$0xff]   ;;  %v1376_v54 = vld [vmem:[#allocation7 + $0x168] ss:$12 sps:$4 sm:$0xff]  }
  0x4a   :  { %894 = vmatprep.subr.bf16.mxu0 %v1326_v16  ;;  %v1372_v51 = vld [vmem:[#allocation7 + $0x98] ss:$12 sps:$4 sm:$0xff]   ;;  %v1375_v53 = vld [vmem:[#allocation7 + $0x170] ss:$12 sps:$4 sm:$0xff]   ;;  %v1381_v57 = vld [vmem:[#allocation7 + $0x248] ss:$12 sps:$4 sm:$0xff]  }
  0x4b   :  { %1254 = vmatpush3.bf16.msra.mxu1 %v1347_v22  ;;  %v1373_v52 = vld [vmem:[#allocation7 + $0x16c] ss:$12 sps:$4 sm:$0xff]   ;;  %v1377_v55 = vld [vmem:[#allocation7 + $0xb0] ss:$12 sps:$4 sm:$0xff]   ;;  %v1520_v58 = vmov 1966171168  }
  0x4c   :  { %1255 = vmatprep.subr.bf16.mxu1 %v1350_v25  ;;  %v1380_v56 = vld [vmem:[#allocation7 + $0x184] ss:$12 sps:$4 sm:$0xff]   ;;  %v195_v59 = vunpack.c.l.s4 %v1520_v58  ;;  %v1152_v63 = vld.sshfl [vmem:[%s1651_s2] sm:$0x33 pattern:$0x75316420] }
  0x4d   :  { %895 = vmatpush1.bf16.msra.mxu0 %v1328_v19  ;;  %v193_v2 = vcombine.high %v1152_v63, %v1152_v63  ;;  %v1615_v6 = vsub.s32 0, %v1604_v62  ;;  %v1382_v22 = vld [vmem:[#allocation7 + $0x188] ss:$12 sps:$4 sm:$0xff]   ;;  %v1386_v25 = vld [vmem:[#allocation7 + $0x260] ss:$12 sps:$4 sm:$0xff]   ;;  %vm1138_vm1 = vcmask 7168  }
  0x4e   :  { %896 = vmatprep.subr.bf16.mxu0 %v1329_v21  ;;  %v196_v61 = vunpack.c.0.s8 %v195_v59  ;;  %v1378_v21 = vld [vmem:[#allocation7 + $0x180] ss:$12 sps:$4 sm:$0xff]   ;;  %v1408_v58 = vld [vmem:[#allocation7 + $0x210] ss:$12 sps:$4 sm:$0xff]   ;;  %v1412_v59 = vld [vmem:[#allocation7 + $0x218] ss:$12 sps:$4 sm:$0xff]  }
  0x4f   :  { %1256 = vmatpush3.bf16.msra.mxu1 %v1352_v26  ;;  %v1415_v60 = vld [vmem:[#allocation7 + $0x22c] ss:$12 sps:$4 sm:$0xff]  }
  0x50   :  { %1257 = vmatprep.subr.bf16.mxu1 %v1355_v28  ;;  %v1610_v0 = vsub.s32 %v196_v61, %v1604_v62  ;;  %v1416_v61 = vld [vmem:[#allocation7 + $0x2f0] ss:$12 sps:$4 sm:$0xff]  }
  0x51   :  { %897 = vmatpush1.bf16.msra.mxu0 %v1331_v23 }
  0x52   :  { %898 = vmatprep.subr.bf16.mxu0 %v1332_v24  ;;  %v200_v3 = vrot.slane %v1152_v63, %v1610_v0  ;;  %v207_v4 = vrot.slane %v193_v2, %v1610_v0  ;;  %v1385_v24 = vld [vmem:[#allocation7 + $0x19c] ss:$12 sps:$4 sm:$0xff]  }
  0x53   :  { %1258 = vmatpush3.bf16.msra.mxu1 %v1357_v29  ;;  %v1383_v29 = vld [vmem:[#allocation7 + $0x198] ss:$12 sps:$4 sm:$0xff]   ;;  %v1413_v2 = vld [vmem:[#allocation7 + $0x228] ss:$12 sps:$4 sm:$0xff]  }
  0x54   :  { %1259 = vmatprep.subr.bf16.mxu1 %v1360_v31  ;;  %v211_v5 = vpack.i.b16 %v200_v3, %v200_v3  ;;  %v218_v7 = vpack.i.b16 %v207_v4, %v207_v4  ;;  %v209_v11 = vcombine.high %v207_v4, %v207_v4  ;;  %v1420_v4 = vld [vmem:[#allocation7 + $0x244] ss:$12 sps:$4 sm:$0xff]  }
  0x55   :  { %899 = vmatpush1.bf16.msra.mxu0 %v1334_v27 }
  0x56   :  { %900 = vmatprep.subr.bf16.mxu0 %v1335_v30  ;;  %v216_v8 = vrot.slane %v211_v5, %v1615_v6  ;;  %v223_v10 = vrot.slane %v218_v7, %v1615_v6  ;;  %v232_v19 = vpack.i.b16 %v209_v11, %v209_v11  ;;  %v1387_v30 = vld [vmem:[#allocation7 + $0x1a0] ss:$12 sps:$4 sm:$0xff]   ;;  %v1424_v11 = vld [vmem:[#allocation7 + $0x270] ss:$12 sps:$4 sm:$0xff]  }
  0x57   :  { %1260 = vmatpush3.bf16.msra.mxu1 %v1362_v33  ;;  %v1390_v33 = vld [vmem:[#allocation7 + $0x1b4] ss:$12 sps:$4 sm:$0xff]  }
  0x58   :  { %1261 = vmatprep.subr.bf16.mxu1 %v1365_v36  ;;  %v237_v27 = vrot.slane %v232_v19, %v1615_v6  ;;  %v1418_v7 = vld [vmem:[#allocation7 + $0x240] ss:$12 sps:$4 sm:$0xff]   ;;  %v1436_v19 = vld [vmem:[#allocation7 + $0x2d0] ss:$12 sps:$4 sm:$0xff]  }
  0x59   :  { %901 = vmatpush1.bf16.msra.mxu0 %v1337_v32 }
  0x5a   :  { %902 = vmatprep.subr.bf16.mxu0 %v1338_v34  ;;  %v1391_v34 = vld [vmem:[#allocation7 + $0x278] ss:$12 sps:$4 sm:$0xff]  }
  0x5b   :  { %1262 = vmatpush3.bf16.msra.mxu1 %v1367_v38  ;;  %v1392_v38 = vld [vmem:[#allocation7 + $0x1b8] ss:$12 sps:$4 sm:$0xff]  }
  0x5c   :  { %1263 = vmatprep.subr.bf16.mxu1 %v1370_v49  ;;  %v1405_v49 = vld [vmem:[#allocation7 + $0x1fc] ss:$12 sps:$4 sm:$0xff]  }
  0x5d   :  { %903 = vmatpush1.bf16.msra.mxu0 %v1341_v35 }
  0x5e   :  { %904 = vmatprep.subr.bf16.mxu0 %v1343_v37  ;;  %v1388_v37 = vld [vmem:[#allocation7 + $0x1b0] ss:$12 sps:$4 sm:$0xff]  }
  0x5f   :  { %1264 = vmatpush3.bf16.msra.mxu1 %v1372_v51 }
  0x60   :  { %1265 = vmatprep.subr.bf16.mxu1 %v1375_v53  ;;  %v1407_v53 = vld [vmem:[#allocation7 + $0x200] ss:$12 sps:$4 sm:$0xff]  }
  0x61   :  { %905 = vmatpush1.bf16.msra.mxu0 %v1346_v39 }
  0x62   :  { %906 = vmatprep.subr.bf16.mxu0 %v1348_v40  ;;  %v1395_v40 = vld [vmem:[#allocation7 + $0x1cc] ss:$12 sps:$4 sm:$0xff]  }
  0x63   :  { %1266 = vmatpush3.bf16.msra.mxu1 %v1377_v55  ;;  %v1411_v55 = vld [vmem:[#allocation7 + $0x2d8] ss:$12 sps:$4 sm:$0xff]  }
  0x64   :  { %1273 = vmatprep.subr.bf16.mxu1 %v1381_v57 }
  0x65   :  { %907 = vmatpush1.bf16.msra.mxu0 %v1351_v41  ;;  %v1396_v41 = vld [vmem:[#allocation7 + $0x290] ss:$12 sps:$4 sm:$0xff]  }
  0x66   :  { %908 = vmatprep.subr.bf16.mxu0 %v1353_v42  ;;  %v1393_v42 = vld [vmem:[#allocation7 + $0x1c8] ss:$12 sps:$4 sm:$0xff]  }
  0x69   :  { %909 = vmatpush1.bf16.msra.mxu0 %v1356_v43  ;;  %v1397_v43 = vld [vmem:[#allocation7 + $0x1d0] ss:$12 sps:$4 sm:$0xff]  }
  0x6a   :  { %910 = vmatprep.subr.bf16.mxu0 %v1358_v44  ;;  %v1400_v44 = vld [vmem:[#allocation7 + $0x1e4] ss:$12 sps:$4 sm:$0xff]  }
  0x6d   :  { %911 = vmatpush1.bf16.msra.mxu0 %v1361_v45  ;;  %v1401_v45 = vld [vmem:[#allocation7 + $0x2a8] ss:$12 sps:$4 sm:$0xff]  }
  0x6e   :  { %912 = vmatprep.subr.bf16.mxu0 %v1363_v46  ;;  %v208_v46 = vcombine.high %v200_v3, %v200_v3  ;;  %v1417_v3 = vld [vmem:[#allocation7 + $0x230] ss:$12 sps:$4 sm:$0xff]  }
  0x70   :  { %v225_v51 = vpack.i.b16 %v208_v46, %v208_v46 }
  0x71   :  { %913 = vmatpush1.bf16.msra.mxu0 %v1366_v47  ;;  %v1398_v47 = vld [vmem:[#allocation7 + $0x1e0] ss:$12 sps:$4 sm:$0xff]  }
  0x72   :  { %914 = vmatprep.subr.bf16.mxu0 %v1368_v48  ;;  %v1402_v48 = vld [vmem:[#allocation7 + $0x1e8] ss:$12 sps:$4 sm:$0xff]   ;;  %v230_v57 = vrot.slane %v225_v51, %v1615_v6  ;;  %v1114_v51 = vsub.s32 1, %v1604_v62 }
  0x75   :  { %915 = vmatpush1.bf16.msra.mxu0 %v1371_v50  ;;  %v1406_v50 = vld [vmem:[#allocation7 + $0x2c0] ss:$12 sps:$4 sm:$0xff]  }
  0x76   :  { %916 = vmatprep.subr.bf16.mxu0 %v1373_v52  ;;  %v1403_v52 = vld [vmem:[#allocation7 + $0x1f8] ss:$12 sps:$4 sm:$0xff]  }
  0x79   :  { %917 = vmatpush1.bf16.msra.mxu0 %v1376_v54  ;;  %v1410_v54 = vld [vmem:[#allocation7 + $0x214] ss:$12 sps:$4 sm:$0xff]  }
  0x7a   :  { %927 = vmatprep.subr.bf16.mxu0 %v1380_v56 }
 0x111   :  { %v132_v9 = vpop.f32.mrb[0].mxu1 }
 0x112   :  { %v180_v12 = vpack.c.bf16 %v132_v9, %v132_v9  ;;  %v134_v13 = vpop.f32.mrb[1].mxu1  ;;  %v1421_v9 = vld [vmem:[#allocation7 + $0x258] ss:$12 sps:$4 sm:$0xff]  }
 0x113   :  { %v181_v14 = vpack.c.bf16 %v134_v13, %v134_v13  ;;  %v136_v15 = vpop.f32.mrb[2].mxu1  ;;  %v1427_v13 = vld [vmem:[#allocation7 + $0x288] ss:$12 sps:$4 sm:$0xff]  }
 0x114   :  { %v238_v16 = vadd.bf16 %v216_v8, %v180_v12  ;;  %v137_v17 = vpop.f32.mrb[3].mxu1  ;;  %v1423_v8 = vld [vmem:[#allocation7 + $0x25c] ss:$12 sps:$4 sm:$0xff]   ;;  %v1429_v12 = vld [vmem:[#allocation7 + $0x28c] ss:$12 sps:$4 sm:$0xff]  }
 0x115   :  { %v239_v18 = vadd.bf16 %v223_v10, %v181_v14  ;;  %v1426_v10 = vld [vmem:[#allocation7 + $0x274] ss:$12 sps:$4 sm:$0xff]   ;;  %v1432_v14 = vld [vmem:[#allocation7 + $0x2a4] ss:$12 sps:$4 sm:$0xff]  }
 0x116   :  { %v242_v23 = vmax.bf16 %v1519_v1, %v238_v16  ;;  %v1430_v15 = vld [vmem:[#allocation7 + $0x2a0] ss:$12 sps:$4 sm:$0xff]   ;;  %v1435_v16 = vld [vmem:[#allocation7 + $0x2bc] ss:$12 sps:$4 sm:$0xff]   ;;  %v1433_v17 = vld [vmem:[#allocation7 + $0x2b8] ss:$12 sps:$4 sm:$0xff]  }
 0x117   :  { %v243_v20 = vmax.bf16 %v1519_v1, %v239_v18  ;;  %v1438_v18 = vld [vmem:[#allocation7 + $0x2d4] ss:$12 sps:$4 sm:$0xff]  }
 0x119   :  { %918 = vmatprep.mubr.bf16.mxu0 %v243_v20  ;;  %1000 = vmatprep.mubr.bf16.mxu1 %v243_v20  ;;  %v1621_v26 = vpop.f32.mrb[4].mxu1  ;;  %v1441_v20 = vld [vmem:[#allocation7 + $0x2ec] ss:$12 sps:$4 sm:$0xff]  }
 0x11a   :  { %919 = vmatmul.mubr.bf16.vlgmr.msra.gmra.mrb[0].mxu0 %v242_v23  ;;  %1001 = vmatmul.mubr.bf16.vlgmr.msra.gmra.mrb[8].mxu1 %v242_v23  ;;  %v175_v28 = vpop.f32.mrb[5].mxu1  ;;  %v182_v56 = vpack.c.bf16 %v1621_v26, %v1621_v26 }
 0x11b   :  { %928 = vmatpush1.bf16.msra.mxu0 %v1378_v21  ;;  %1274 = vmatpush3.bf16.msra.mxu1 %v1382_v22  ;;  %v183_v31 = vpack.c.bf16 %v175_v28, %v175_v28  ;;  %v177_v32 = vpop.f32.mrb[6].mxu1  ;;  %v1439_v21 = vld [vmem:[#allocation7 + $0x2e8] ss:$12 sps:$4 sm:$0xff]  }
 0x11c   :  { %929 = vmatprep.subr.bf16.mxu0 %v1385_v24  ;;  %1275 = vmatprep.subr.bf16.mxu1 %v1386_v25  ;;  %v178_v35 = vpop.f32.mrb[7].mxu1  ;;  %v240_v63 = vadd.bf16 %v230_v57, %v182_v56  ;;  %v1118_v56 = vsub.s32 2, %v1604_v62 }
 0x11d   :  { %v241_v36 = vadd.bf16 %v237_v27, %v183_v31 }
 0x11e   :  { %v244_v5 = vmax.bf16 %v1519_v1, %v240_v63 }
 0x11f   :  { %930 = vmatpush1.bf16.msra.mxu0 %v1383_v29  ;;  %1276 = vmatpush3.bf16.msra.mxu1 %v1387_v30  ;;  %v245_v39 = vmax.bf16 %v1519_v1, %v241_v36 }
 0x120   :  { %931 = vmatprep.subr.bf16.mxu0 %v1390_v33  ;;  %1277 = vmatprep.subr.bf16.mxu1 %v1391_v34  ;;  %v1249_v33 = vld.sshfl [vmem:[%s1653_s4] sm:$0x13 pattern:$0x75316420] }
 0x121   :  { %1040 = vmatprep.mubr.bf16.mxu1 %v245_v39  ;;  %959 = vmatprep.mubr.bf16.mxu0 %v245_v39  ;;  %v1067_v34 = vrot.slane %v1249_v33, %v1610_v0  ;;  %v1060_v36 = vcombine.high %v1249_v33, %v1249_v33 }
 0x123   :  { %932 = vmatpush1.bf16.msra.mxu0 %v1388_v37  ;;  %1278 = vmatpush3.bf16.msra.mxu1 %v1392_v38  ;;  %v1075_v35 = vcombine.high %v1067_v34, %v1067_v34  ;;  %v1074_v38 = vrot.slane %v1060_v36, %v1610_v0  ;;  %v1077_v39 = vpack.i.b16 %v1067_v34, %v1067_v34 }
 0x124   :  { %933 = vmatprep.subr.bf16.mxu0 %v1395_v40  ;;  %1279 = vmatprep.subr.bf16.mxu1 %v1396_v41 }
 0x125   :  { %v1091_v37 = vpack.i.b16 %v1075_v35, %v1075_v35 }
 0x127   :  { %934 = vmatpush1.bf16.msra.mxu0 %v1393_v42  ;;  %1280 = vmatpush3.bf16.msra.mxu1 %v1397_v43  ;;  %v1096_v41 = vrot.slane %v1091_v37, %v1615_v6  ;;  %v1084_v42 = vpack.i.b16 %v1074_v38, %v1074_v38  ;;  %v1082_v43 = vrot.slane %v1077_v39, %v1615_v6 }
 0x128   :  { %935 = vmatprep.subr.bf16.mxu0 %v1400_v44  ;;  %1281 = vmatprep.subr.bf16.mxu1 %v1401_v45 }
 0x129   :  { %v1089_v46 = vrot.slane %v1084_v42, %v1615_v6 }
 0x12b   :  { %936 = vmatpush1.bf16.msra.mxu0 %v1398_v47  ;;  %1282 = vmatpush3.bf16.msra.mxu1 %v1402_v48 }
 0x12c   :  { %937 = vmatprep.subr.bf16.mxu0 %v1405_v49  ;;  %1283 = vmatprep.subr.bf16.mxu1 %v1406_v50 }
 0x12f   :  { %938 = vmatpush1.bf16.msra.mxu0 %v1403_v52  ;;  %1284 = vmatpush3.bf16.msra.mxu1 %v1407_v53 }
 0x130   :  { %939 = vmatprep.subr.bf16.mxu0 %v1410_v54  ;;  %1285 = vmatprep.subr.bf16.mxu1 %v1411_v55  ;;  %v1106_v55 = vld [vmem:[%s1654_s5] sm:$0x7] }
 0x133   :  { %940 = vmatpush1.bf16.msra.mxu0 %v1408_v58  ;;  %1286 = vmatpush3.bf16.msra.mxu1 %v1412_v59  ;;  %v1111_v58 = vrot.slane %v1106_v55, %v1615_v6 }
 0x134   :  { %941 = vmatprep.subr.bf16.mxu0 %v1415_v60  ;;  %1287 = vmatprep.subr.bf16.mxu1 %v1416_v61  ;;  %v1115_v60 = vrot.slane %v1106_v55, %v1114_v51 }
 0x137   :  { %942 = vmatpush1.bf16.msra.mxu0 %v1413_v2  ;;  %1288 = vmatpush3.bf16.msra.mxu1 %v1417_v3  ;;  %v1119_v3 = vrot.slane %v1106_v55, %v1118_v56 }
 0x138   :  { %943 = vmatprep.subr.bf16.mxu0 %v1420_v4 }
 0x13a   :  { %1041 = vmatmul.mubr.bf16.vlgmr.msra.gmra.mrb[12].mxu1 %v244_v5 }
 0x13b   :  { %944 = vmatpush1.bf16.msra.mxu0 %v1418_v7 }
 0x13c   :  { %945 = vmatprep.subr.bf16.mxu0 %v1423_v8 }
 0x13f   :  { %946 = vmatpush1.bf16.msra.mxu0 %v1421_v9 }
 0x140   :  { %947 = vmatprep.subr.bf16.mxu0 %v1426_v10  ;;  %v1250_v10 = vld [vmem:[#allocation2] ss:$0 sm:$0xff] }
 0x143   :  { %948 = vmatpush1.bf16.msra.mxu0 %v1424_v11 }
 0x144   :  { %949 = vmatprep.subr.bf16.mxu0 %v1429_v12 }
 0x147   :  { %950 = vmatpush1.bf16.msra.mxu0 %v1427_v13 }
 0x148   :  { %951 = vmatprep.subr.bf16.mxu0 %v1432_v14 }
 0x14b   :  { %952 = vmatpush1.bf16.msra.mxu0 %v1430_v15 }
 0x14c   :  { %953 = vmatprep.subr.bf16.mxu0 %v1435_v16 }
 0x14f   :  { %954 = vmatpush1.bf16.msra.mxu0 %v1433_v17 }
 0x150   :  { %955 = vmatprep.subr.bf16.mxu0 %v1438_v18 }
 0x153   :  { %956 = vmatpush1.bf16.msra.mxu0 %v1436_v19 }
 0x154   :  { %957 = vmatprep.subr.bf16.mxu0 %v1441_v20 }
 0x157   :  { %958 = vmatpush1.bf16.msra.mxu0 %v1439_v21 }
 0x15a   :  { %960 = vmatmul.mubr.bf16.vlgmr.msra.gmra.mrb[0].mxu0 %v244_v5 }
 0x1ed   :  { %v1267_v22 = vpop.f32.mrb[8].mxu1 }
 0x1ee   :  { %v1268_v23 = vpop.f32.mrb[9].mxu1 }
 0x1ef   :  { %v1269_v24 = vadd.f32 %v1268_v23, %v1267_v22  ;;  %v1270_v25 = vpop.f32.mrb[10].mxu1 }
 0x1f0   :  { %v1271_v26 = vpop.f32.mrb[11].mxu1 }
 0x20d   :  { %v1289_v27 = vpop.f32.mrb[12].mxu1 }
 0x20e   :  { %v1290_v28 = vpop.f32.mrb[13].mxu1 }
 0x20f   :  { %v1291_v29 = vadd.f32 %v1290_v28, %v1289_v27  ;;  %v1292_v30 = vpop.f32.mrb[14].mxu1 }
 0x210   :  { %v1293_v31 = vpop.f32.mrb[15].mxu1 }
 0x211   :  { %v1043_v32 = vadd.f32 %v1291_v29, %v1269_v24 }
 0x213   :  { %v1050_v40 = vpack.c.bf16 %v1043_v32, %v1043_v32 }
 0x215   :  { %v1099_v44 = vadd.bf16 %v1096_v41, %v1050_v40 }
 0x217   :  { %v1102_v54 = vmax.bf16 %v1519_v1, %v1099_v44 }
 0x219   :  { %v1105_v2 = vunpack.c.l.bf16 %v1102_v54 }
 0x21b   :  { %v1125_v7 = vmul.f32 %v1119_v3, %v1105_v2 }
 0x22d   :  { %v961_v45 = vpop.f32.mrb[0].mxu0 }
 0x22e   :  { %v1048_v47 = vpack.c.bf16 %v961_v45, %v961_v45  ;;  %v963_v48 = vpop.f32.mrb[1].mxu0 }
 0x22f   :  { %v1049_v49 = vpack.c.bf16 %v963_v48, %v963_v48  ;;  %v965_v50 = vpop.f32.mrb[2].mxu0 }
 0x230   :  { %v1097_v52 = vadd.bf16 %v1082_v43, %v1048_v47  ;;  %v966_v53 = vpop.f32.mrb[3].mxu0 }
 0x231   :  { %v1098_v0 = vadd.bf16 %v1089_v46, %v1049_v49 }
 0x232   :  { %v1100_v57 = vmax.bf16 %v1519_v1, %v1097_v52 }
 0x233   :  { %v1101_v59 = vmax.bf16 %v1519_v1, %v1098_v0 }
 0x234   :  { %v1103_v61 = vunpack.c.l.bf16 %v1100_v57 }
 0x235   :  { %v1104_v63 = vunpack.c.l.bf16 %v1101_v59 }
 0x236   :  { %v1123_v4 = vmul.f32 %v1111_v58, %v1103_v61 }
 0x237   :  { %v1124_v5 = vmul.f32 %v1115_v60, %v1104_v63 }
 0x239   :  { %v1126_v8 = vadd.f32 %v1124_v5, %v1123_v4 }
 0x23b   :  { %v1127_v9 = vadd.f32 %v1126_v8, %v1125_v7 }
 0x23d   :  { %1128 = vadd.xlane.f32.xlu0 %v1127_v9 }
 0x2ca   :  { %v1129_v11 = vpop.xlane.xlu0 %1128 }
 0x2cb   :  { %v1137_v62 = vadd.f32 %v1250_v10, %v1129_v11 }
 0x2cd   :  { %1139 = vst.msk [vmem:[%s1656_s7] sm:$0xff] %vm1138_vm1, %v1137_v62 }
 0x2ce   :  { %1144 = vsyncpa [#allocation4], 1 }
 0x2cf   :  { %1145 = vsyncpa [#allocation6], 1 }

</bundles_post_ra>
